<compile_context>
chip_gen: v5e
topology: v5e:2x2
jax: 0.10.0
libtpu: 0.0.40
codegen_flags: <defaults>
</compile_context>

<pallas_src>
import functools

import jax
import jax.numpy as jnp
from jax.experimental import pallas as pl
from jax.experimental.pallas import tpu as pltpu


def _cdiv(a, b):
    return (a + b - 1) // b


def _round_up(a, b):
    return _cdiv(a, b) * b


def _gap_kernel(x_ref, o_ref, acc_ref, *, tl, L, ncol_total, masked,
                lane_accum):
    p = pl.program_id(1)          # column shard (parallel)
    j = pl.program_id(2)          # column tile within shard (reduction)
    ncol_per = pl.num_programs(2)
    tm = x_ref.shape[0]

    x = x_ref[...].astype(jnp.float32)

    if masked:
        # Global column block this (p, j) owns; phantom tiles (past the end of
        # the array) and the ragged tail of the last real tile contribute 0.
        blk = p * ncol_per + j
        limit = jnp.where(blk < ncol_total, L - blk * tl, 0).astype(jnp.int32)
        lane = jax.lax.broadcasted_iota(jnp.int32, (tm, tl), 1)
        x = jnp.where(lane < limit, x, 0.0)

    if not lane_accum:
        # tl == L and L is not a multiple of 128  =>  exactly one reduction
        # step per row block; do the cross-lane reduce directly.
        o_ref[...] = jnp.sum(x, axis=-1, keepdims=True)
        return

    @pl.when(j == 0)
    def _():
        acc_ref[...] = jnp.zeros_like(acc_ref)

    # Lane-dense accumulation: fold the tile into 128 lanes with pure VPU adds
    # (128-aligned static slices => no relayout), keeping pace with the DMA
    # feed on all generations.  The single cross-lane reduce is deferred to the
    # epilogue below.
    nk = tl // 128
    part = x[:, 0:128]
    for k in range(1, nk):
        part = part + x[:, k * 128:(k + 1) * 128]
    acc_ref[...] += part

    @pl.when(j == ncol_per - 1)
    def _():
        o_ref[...] = jnp.sum(acc_ref[...], axis=-1, keepdims=True)


def global_avg_pool3d(x, *, tm_cap=256, tile_bytes=8 * 1024 * 1024,
                      max_nk=256):
    """x: (N, C, D, H, W) -> (N, C, 1, 1, 1), mean over the spatial dims."""
    N, C, D, H, W = x.shape
    M = N * C
    L = D * H * W
    count = float(L)
    itemsize = jnp.dtype(x.dtype).itemsize
    lanes = 128

    x2 = x.reshape(M, L)  # contiguous reshape: no data movement

    # Row (sublane) tile: multiple of 8 (or full extent when M <= 8), chosen so
    # there are >= 2 row blocks whenever possible (v7x megacore sharding).
    if M <= 8:
        tm = M
    else:
        tm = min(tm_cap, _round_up(_cdiv(M, 2), 8))
    nrow = _cdiv(M, tm)

    # Column (lane) tile: large lane-dense tiles bounded by the per-buffer VMEM
    # budget and by the in-kernel unroll cap (max_nk 128-lane slices).
    budget_cols = max(tile_bytes // max(tm * itemsize, 1), lanes)
    max_tl = max((budget_cols // lanes) * lanes, lanes)
    max_tl = min(max_tl, max_nk * lanes)
    tl = L if L <= max_tl else max_tl
    ncol_total = _cdiv(L, tl)

    # Column-shard parallel split: only needed when the row axis cannot feed
    # both v7x TensorCores (v5e/v6e are unaffected; P=1 there is typical).
    P = 2 if (nrow < 2 and ncol_total >= 2) else 1
    ncol_per = _cdiv(ncol_total, P)

    phantom = (P * ncol_per != ncol_total)     # last shard has unowned tiles
    masked = phantom or (L % tl != 0)          # ragged last column tile
    lane_accum = (tl % lanes == 0)

    if phantom:
        def x_index(i, p, j):
            # Clamp so the auto-DMA never addresses past the array; the kernel
            # masks the (re-read) tile to zero anyway.
            return (i, jnp.minimum(p * ncol_per + j, ncol_total - 1))
    else:
        def x_index(i, p, j):
            return (i, p * ncol_per + j)

    grid = (nrow, P, ncol_per)

    in_buf = tm * tl * itemsize                       # one input buffer
    vmem_limit = int(min(64 << 20,                    # stay under v7x physical
                         max(32 << 20,
                             2 * in_buf + tm * lanes * 4 + (4 << 20))))

    partial = pl.pallas_call(
        functools.partial(_gap_kernel, tl=tl, L=L, ncol_total=ncol_total,
                          masked=masked, lane_accum=lane_accum),
        out_shape=jax.ShapeDtypeStruct((P, nrow * tm, 1), jnp.float32),
        grid_spec=pltpu.PrefetchScalarGridSpec(
            num_scalar_prefetch=0,
            grid=grid,
            in_specs=[pl.BlockSpec((tm, tl), x_index)],
            out_specs=pl.BlockSpec((None, tm, 1), lambda i, p, j: (p, i, 0)),
            scratch_shapes=[pltpu.VMEM((tm, lanes), jnp.float32)],
        ),
        compiler_params=pltpu.CompilerParams(
            dimension_semantics=("parallel", "parallel", "arbitrary"),
            vmem_limit_bytes=vmem_limit),
        cost_estimate=pl.CostEstimate(
            flops=M * L,
            transcendentals=0,
            bytes_accessed=M * L * itemsize + P * nrow * tm * 4),
    )(x2)

    # Tiny post-processing: add the P shards, drop padded rows, divide, cast.
    out = (jnp.sum(partial, axis=0)[:M] / count).astype(x.dtype)
    return out.reshape(N, C, 1, 1, 1)


if __name__ == "__main__":
    key = jax.random.PRNGKey(0)

    def ref_pool(x):
        return jnp.sum(x, axis=(2, 3, 4), keepdims=True) / (
            x.shape[2] * x.shape[3] * x.shape[4])

    # Primary NCDHW test shape.
    N, C, D, H, W = 2, 8, 4, 16, 16
    x = jax.random.normal(key, (N, C, D, H, W), jnp.float32)
    out = jax.jit(global_avg_pool3d)(x)
    jax.block_until_ready(out)
    assert out.shape == (N, C, 1, 1, 1), out.shape
    assert out.dtype == jnp.float32
    assert jnp.allclose(out, ref_pool(x), rtol=1e-5, atol=1e-5), \
        float(jnp.max(jnp.abs(out - ref_pool(x))))

    # Unaligned spatial extent: full-extent column block (no 8/128 padding).
    x_odd = jax.random.normal(jax.random.PRNGKey(1), (1, 3, 3, 5, 7),
                              jnp.float32)
    out_odd = jax.jit(global_avg_pool3d)(x_odd)
    jax.block_until_ready(out_odd)
    assert jnp.allclose(out_odd, ref_pool(x_odd), rtol=1e-5, atol=1e-5)

    # Ragged column tiles + in-kernel masking (tiny tile_bytes forces tl < L).
    x_rag = jax.random.normal(jax.random.PRNGKey(2), (2, 20, 5, 9, 11),
                              jnp.float32)
    out_rag = jax.jit(functools.partial(global_avg_pool3d, tile_bytes=1))(x_rag)
    jax.block_until_ready(out_rag)
    assert jnp.allclose(out_rag, ref_pool(x_rag), rtol=1e-5, atol=1e-5)

    # Tiny-M path: column-shard split (P=2) with a phantom (masked) last tile.
    x_par = jax.random.normal(jax.random.PRNGKey(3), (1, 4, 5, 7, 9),
                              jnp.float32)
    out_par = jax.jit(functools.partial(global_avg_pool3d, tile_bytes=1))(x_par)
    jax.block_until_ready(out_par)
    assert jnp.allclose(out_par, ref_pool(x_par), rtol=1e-5, atol=1e-5)

    print("KERNEL_OK")
</pallas_src>

<mosaic_0001>
module attributes {stable_mosaic.version = 11 : i64} {
  func.func @_gap_kernel(%arg0: i32, %arg1: i32, %arg2: i32, %arg3: memref<8x1024xf32, #tpu.memory_space<vmem>>, %arg4: memref<1x8x1xf32, #tpu.memory_space<vmem>>, %arg5: memref<8x128xf32, #tpu.memory_space<vmem>>) attributes {dimension_semantics = [#tpu.dimension_semantics<parallel>, #tpu.dimension_semantics<parallel>, #tpu.dimension_semantics<arbitrary>], iteration_bounds = array<i64: 2, 1, 1>, scalar_prefetch = 0 : i64, scratch_operands = 1 : i64, tpu.core_type = #tpu.core_type<tc>, window_params = [{transform_indices = @transform_0, window_bounds = array<i64: 8, 1024>}, {transform_indices = @transform_1, window_bounds = array<i64: 1, 8, 1>}]} {
    %c0 = arith.constant 0 : index
    %c0_0 = arith.constant 0 : index
    %0 = vector.load %arg3[%c0, %c0_0] : memref<8x1024xf32, #tpu.memory_space<vmem>>, vector<8x1024xf32>
    %c0_i32 = arith.constant 0 : i32
    %1 = arith.cmpi eq, %arg2, %c0_i32 : i32
    %2 = arith.extui %1 : i1 to i32
    %c0_i32_1 = arith.constant 0 : i32
    %3 = arith.cmpi ne, %2, %c0_i32_1 : i32
    scf.if %3 {
      %cst = arith.constant 0.000000e+00 : f32
      %25 = vector.broadcast %cst : f32 to vector<8x128xf32>
      %c0_8 = arith.constant 0 : index
      %c0_9 = arith.constant 0 : index
      %26 = vector.load %arg5[%c0_8, %c0_9] : memref<8x128xf32, #tpu.memory_space<vmem>>, vector<8x128xf32>
      tpu.vector_store %arg5[%c0_8, %c0_9], %25 {strides = array<i32>} : memref<8x128xf32, #tpu.memory_space<vmem>>, vector<8x128xf32>,
    } else {
    }
    %4 = vector.extract_strided_slice %0 {offsets = [0, 0], sizes = [8, 128], strides = [1, 1]} : vector<8x1024xf32> to vector<8x128xf32>
    %5 = vector.extract_strided_slice %0 {offsets = [0, 128], sizes = [8, 128], strides = [1, 1]} : vector<8x1024xf32> to vector<8x128xf32>
    %6 = arith.addf %4, %5 : vector<8x128xf32>
    %7 = vector.extract_strided_slice %0 {offsets = [0, 256], sizes = [8, 128], strides = [1, 1]} : vector<8x1024xf32> to vector<8x128xf32>
    %8 = arith.addf %6, %7 : vector<8x128xf32>
    %9 = vector.extract_strided_slice %0 {offsets = [0, 384], sizes = [8, 128], strides = [1, 1]} : vector<8x1024xf32> to vector<8x128xf32>
    %10 = arith.addf %8, %9 : vector<8x128xf32>
    %11 = vector.extract_strided_slice %0 {offsets = [0, 512], sizes = [8, 128], strides = [1, 1]} : vector<8x1024xf32> to vector<8x128xf32>
    %12 = arith.addf %10, %11 : vector<8x128xf32>
    %13 = vector.extract_strided_slice %0 {offsets = [0, 640], sizes = [8, 128], strides = [1, 1]} : vector<8x1024xf32> to vector<8x128xf32>
    %14 = arith.addf %12, %13 : vector<8x128xf32>
    %15 = vector.extract_strided_slice %0 {offsets = [0, 768], sizes = [8, 128], strides = [1, 1]} : vector<8x1024xf32> to vector<8x128xf32>
    %16 = arith.addf %14, %15 : vector<8x128xf32>
    %17 = vector.extract_strided_slice %0 {offsets = [0, 896], sizes = [8, 128], strides = [1, 1]} : vector<8x1024xf32> to vector<8x128xf32>
    %18 = arith.addf %16, %17 : vector<8x128xf32>
    %c0_2 = arith.constant 0 : index
    %c0_3 = arith.constant 0 : index
    %19 = vector.load %arg5[%c0_2, %c0_3] : memref<8x128xf32, #tpu.memory_space<vmem>>, vector<8x128xf32>
    %20 = arith.addf %19, %18 : vector<8x128xf32>
    %c0_4 = arith.constant 0 : index
    %c0_5 = arith.constant 0 : index
    %21 = vector.load %arg5[%c0_4, %c0_5] : memref<8x128xf32, #tpu.memory_space<vmem>>, vector<8x128xf32>
    tpu.vector_store %arg5[%c0_4, %c0_5], %20 {strides = array<i32>} : memref<8x128xf32, #tpu.memory_space<vmem>>, vector<8x128xf32>,
    %c0_i32_6 = arith.constant 0 : i32
    %22 = arith.cmpi eq, %arg2, %c0_i32_6 : i32
    %23 = arith.extui %22 : i1 to i32
    %c0_i32_7 = arith.constant 0 : i32
    %24 = arith.cmpi ne, %23, %c0_i32_7 : i32
    scf.if %24 {
      %c0_8 = arith.constant 0 : index
      %c0_9 = arith.constant 0 : index
      %25 = vector.load %arg5[%c0_8, %c0_9] : memref<8x128xf32, #tpu.memory_space<vmem>>, vector<8x128xf32>
      %cst = arith.constant dense<0.000000e+00> : vector<8xf32>
      %26 = vector.multi_reduction <add>, %25, %cst [1] : vector<8x128xf32> to vector<8xf32>
      %27 = vector.shape_cast %26 : vector<8xf32> to vector<8x1xf32>
      %c0_10 = arith.constant 0 : index
      %c0_11 = arith.constant 0 : index
      %c0_12 = arith.constant 0 : index
      %28 = vector.load %arg4[%c0_10, %c0_11, %c0_12] : memref<1x8x1xf32, #tpu.memory_space<vmem>>, vector<1x8x1xf32>
      %29 = vector.shape_cast %28 : vector<1x8x1xf32> to vector<8x1xf32>
      %30 = vector.shape_cast %27 : vector<8x1xf32> to vector<1x8x1xf32>
      tpu.vector_store %arg4[%c0_10, %c0_11, %c0_12], %30 {strides = array<i32>} : memref<1x8x1xf32, #tpu.memory_space<vmem>>, vector<1x8x1xf32>,
    } else {
    }
    return
  }
  func.func @transform_0(%arg0: i32, %arg1: i32, %arg2: i32) -> (i32, i32) {
    %c1_i32 = arith.constant 1 : i32
    %0 = arith.muli %arg1, %c1_i32 : i32
    %1 = arith.addi %0, %arg2 : i32
    %c0_i32 = arith.constant 0 : i32
    return %arg0, %1 : i32, i32
  }
  func.func @transform_1(%arg0: i32, %arg1: i32, %arg2: i32) -> (i32, i32, i32) {
    %c0_i32 = arith.constant 0 : i32
    %c0_i32_0 = arith.constant 0 : i32
    return %arg1, %arg0, %c0_i32 : i32, i32, i32
  }
}

</mosaic_0001>

<bundles_post_ra>
// kernel: global_avg_pool3d.1
= control target key start
LH: loop header
LB: loop body
LE: loop exit
PB: predicated region body
PF: predicated region fallthrough
CT: control target
= control target key end

     0   :  { %s353_s6 = smov 0   ;;  %s355_s7 = smov 0   ;;  %s386_s0 = inlined_call_operand.vmem [shape: f32[16,1024], index: 0, kind: input, shape index: {}]   ;;  %s387_s1 = inlined_call_operand.vmem [shape: f32[1,16,1], index: 1, kind: output, shape index: {}]  }
   0x1   :  { %s357_s8 = smov 0  }
   0x2 LB: > { %s30_s9 = sadd.s32 1, %s337_s7  ;;  %p288_p0 = scmp.ge.s32.totalorder %s341_s8, 1  ;;  %s341_s8 = sphi %s357_s8, %s11_s8   ;;  %s337_s7 = sphi %s355_s7, %s389_s7   ;;  %s333_s6 = sphi %s353_s6, %s388_s6  }
   0x3   : > { %p32_p1 = scmp.ge.s32.totalorder %s30_s9, 2  ;;  %p119_p2 = scmp.lt.s32.totalorder %s341_s8, 3 }
   0x5   : > { %s391_s9 = smov (%p32_p1, %s30_s9), 0  ;;  %p120_p3 = pnand %p288_p0, %p119_p2 }
   0x6   : > { %p149_p4 = scmp.lt.s32.totalorder (!%p120_p3), %s333_s6, 1 }
   0x7   : > { %123 = sbr.rel (%p120_p3) target bundleno = 147 (0x93), region = 24 }
   0xc   : > { %s393_s6 = smov (!%p149_p4, %s333_s6), 1  ;;  %vm196_vm0 = vcmask 7168  }
   0xd   : > { %s294_s10 = sshll.u32 %s393_s6, 6  ;;  %s291_s14 = sshll.u32 %s393_s6, 3 }
   0xe   : > { %s156_s13 = scalar_lea.vmem %s386_s0, %s294_s10  ;;  %s166_s17 = scalar_lea.vmem %s387_s1, %s291_s14 }
   0xf   : > { %v167_v0 = vld [vmem:[%s156_s13] sm:$0xff]  ;;  %v168_v1 = vld [vmem:[%s156_s13 + $0x8] sm:$0xff]  ;;  %v169_v2 = vld [vmem:[%s156_s13 + $0x10] sm:$0xff] }
  0x10   : > { %v180_v3 = vadd.f32 %v168_v1, %v167_v0  ;;  %v170_v4 = vld [vmem:[%s156_s13 + $0x18] sm:$0xff]  ;;  %v171_v6 = vld [vmem:[%s156_s13 + $0x20] sm:$0xff]  ;;  %v172_v8 = vld [vmem:[%s156_s13 + $0x28] sm:$0xff] }
  0x11   : > { %v173_v10 = vld [vmem:[%s156_s13 + $0x30] sm:$0xff]  ;;  %v174_v12 = vld [vmem:[%s156_s13 + $0x38] sm:$0xff] }
  0x12   : > { %v181_v5 = vadd.f32 %v180_v3, %v169_v2 }
  0x14   : > { %v182_v7 = vadd.f32 %v181_v5, %v170_v4 }
  0x16   : > { %v183_v9 = vadd.f32 %v182_v7, %v171_v6 }
  0x18   : > { %v184_v11 = vadd.f32 %v183_v9, %v172_v8 }
  0x1a   : > { %v185_v13 = vadd.f32 %v184_v11, %v173_v10 }
  0x1c   : > { %v186_v14 = vadd.f32 %v185_v13, %v174_v12 }
  0x1e   : > { %194 = vadd.xlane.f32.xlu0 %v186_v14 }
  0x91   : > { %v195_v15 = vpop.xlane.xlu0 %194 }
  0x92   : > { %197 = vst.msk [vmem:[%s166_s17] sm:$0xff] %vm196_vm0, %v195_v15 }
  0x93 PF: > { %s11_s8 = sadd.s32 1, %s341_s8   ;;  %s388_s6 = smov %s337_s7 }
  0x94   : > { %p8_p5 = scmp.ge.s32.totalorder %s11_s8, 4   ;;  %s389_s7 = smov %s391_s9 }
  0x96   :  { %10 = sbr.rel (!%p8_p5) target bundleno = 2 (0x2), region = 62 }

</bundles_post_ra>
